<compile_context>
chip_gen: v7x
topology: tpu7x:2x2x1
jax: 0.10.0
libtpu: 0.0.40
codegen_flags: <defaults>
</compile_context>

<pallas_src>
import jax
import jax.numpy as jnp
from jax.experimental import pallas as pl
from jax.experimental.pallas import tpu as pltpu

LANE = 512                  # lane-dense last dim (multiple of 128)
MAX_BLOCK_ROWS = 1024       # (1024, 512) f32 tile = 2 MiB per input
MIN_PALLAS_ELEMS = 1 << 18  # below ~1 MiB of f32 input, XLA's fused reduce wins


def _cdiv(a, b):
    return (a + b - 1) // b


def _default_num_partitions():
    # 2-way split only pays off on megacore (2 TensorCores / chip) parts.
    try:
        kind = jax.devices()[0].device_kind.lower()
    except Exception:
        return 1
    return 2 if "v7" in kind else 1


def _mse_ref(x, t):
    return jnp.mean((x.astype(jnp.float32) - t.astype(jnp.float32)) ** 2)


def content_loss(x, target, *, num_partitions=None,
                 min_pallas_elems=MIN_PALLAS_ELEMS):
    """ContentLoss.forward: returns (x, mse_loss(x, target)); x is unchanged."""
    assert x.shape == target.shape
    n = x.size
    rows = n // LANE

    # Fast path: small inputs (pallas_call fixed cost dwarfs the work) or
    # ragged inputs (kernel would need a full padded/sliced HBM copy).
    if n < min_pallas_elems or n % LANE != 0 or rows < 8:
        return x, _mse_ref(x, target)

    if num_partitions is None:
        num_partitions = _default_num_partitions()
    num_partitions = max(1, int(num_partitions))

    # Free (no-copy) reshape to a lane-dense slab.  bf16 inputs stream at half
    # the bytes; accumulation below is always f32.
    x2 = x.reshape(rows, LANE)
    t2 = target.reshape(rows, LANE)

    block_rows = min(MAX_BLOCK_ROWS, (rows // 8) * 8)  # multiple of 8, <= rows
    num_blocks = _cdiv(rows, block_rows)               # real blocks (last may be partial)
    chunks = _cdiv(num_blocks, num_partitions)         # grid steps per partition
    covered_rows = num_partitions * chunks * block_rows
    needs_clamp = num_partitions * chunks > num_blocks  # some grid steps are fully OOB
    needs_mask = covered_rows > rows                     # some tile rows are invalid
    groups = block_rows // 8

    def in_map(c, j):
        b = j * num_partitions + c            # interleaved block assignment
        if needs_clamp:
            # Fully out-of-bounds steps re-read the last real block; their
            # contribution is zeroed by the in-kernel row mask.
            b = jnp.minimum(b, num_blocks - 1)
        return (b, 0)

    def kernel(x_ref, t_ref, out_ref, acc_ref):
        c = pl.program_id(0)
        j = pl.program_id(1)

        @pl.when(j == 0)
        def _():
            acc_ref[...] = jnp.zeros_like(acc_ref)

        d = x_ref[...].astype(jnp.float32) - t_ref[...].astype(jnp.float32)
        sq = d * d
        if needs_mask:
            # Zero rows past the end of the real data (partial / clamped tiles).
            row0 = (j * num_partitions + c) * block_rows
            ridx = row0 + jax.lax.broadcasted_iota(
                jnp.int32, (block_rows, LANE), 0)
            sq = jnp.where(ridx < rows, sq, 0.0)

        # Sublane-group accumulation into a small (8, LANE) accumulator:
        # pure VALU vreg adds (no XLU), tiny VMEM footprint.
        acc_ref[...] += jnp.sum(sq.reshape(groups, 8, LANE), axis=0)

        @pl.when(j == pl.num_programs(1) - 1)
        def _():
            # Single cross-lane/sublane reduction per partition, done once.
            out_ref[...] = jnp.sum(acc_ref[...]).reshape(1, 1, 1)

    partials = pl.pallas_call(
        kernel,
        out_shape=jax.ShapeDtypeStruct((num_partitions, 1, 1), jnp.float32),
        grid_spec=pltpu.PrefetchScalarGridSpec(
            num_scalar_prefetch=0,
            grid=(num_partitions, chunks),
            in_specs=[
                pl.BlockSpec((block_rows, LANE), in_map),
                pl.BlockSpec((block_rows, LANE), in_map),
            ],
            out_specs=pl.BlockSpec((1, 1, 1), lambda c, j: (c, 0, 0)),
            scratch_shapes=[pltpu.VMEM((8, LANE), jnp.float32)],
        ),
        compiler_params=pltpu.CompilerParams(
            dimension_semantics=("parallel", "arbitrary"),
            vmem_limit_bytes=32 << 20,
        ),
    )(x2, t2)

    loss = jnp.sum(partials) / jnp.float32(n)
    return x, loss


def _check(x, target, **kw):
    x_out, loss = content_loss(x, target, **kw)
    jax.block_until_ready((x_out, loss))
    loss_ref = _mse_ref(x, target)
    assert jnp.allclose(x_out, x), "pass-through mismatch"
    assert jnp.allclose(loss, loss_ref, rtol=1e-5, atol=1e-6), (
        f"loss mismatch: {loss} vs {loss_ref}")


if __name__ == "__main__":
    key = jax.random.PRNGKey(0)
    kx, kt = jax.random.split(key)

    # 1) Module-consistent small NCHW feature map -> XLA fast path.
    x1 = jax.random.normal(kx, (2, 4, 16, 16), dtype=jnp.float32)
    t1 = jax.random.normal(kt, (2, 4, 16, 16), dtype=jnp.float32)
    _check(x1, t1)

    # 2) Pallas path (forced), single partition, ragged tail (rows=20, block=16).
    x2 = jax.random.normal(kx, (2, 5, 32, 32), dtype=jnp.float32)
    t2 = jax.random.normal(kt, (2, 5, 32, 32), dtype=jnp.float32)
    _check(x2, t2, num_partitions=1, min_pallas_elems=0)

    # 3) Pallas path (forced), 2-way partition exercising the clamp+mask path.
    x3 = jax.random.normal(kx, (2, 6, 32, 32), dtype=jnp.float32)
    t3 = jax.random.normal(kt, (2, 6, 32, 32), dtype=jnp.float32)
    _check(x3, t3, num_partitions=2, min_pallas_elems=0)

    # 4) Auto path on a realistic VGG-sized feature map (takes the kernel path).
    x4 = jax.random.normal(kx, (1, 128, 64, 64), dtype=jnp.float32)
    t4 = jax.random.normal(kt, (1, 128, 64, 64), dtype=jnp.float32)
    _check(x4, t4)

    print("KERNEL_OK")
</pallas_src>

<mosaic_0001>
module attributes {stable_mosaic.version = 11 : i64} {
  func.func @kernel(%arg0: i32, %arg1: i32, %arg2: memref<16x512xf32, #tpu.memory_space<vmem>>, %arg3: memref<16x512xf32, #tpu.memory_space<vmem>>, %arg4: memref<1x1x1xf32, #tpu.memory_space<vmem>>, %arg5: memref<8x512xf32, #tpu.memory_space<vmem>>) attributes {dimension_semantics = [#tpu.dimension_semantics<parallel>, #tpu.dimension_semantics<arbitrary>], iteration_bounds = array<i64: 1, 2>, scalar_prefetch = 0 : i64, scratch_operands = 1 : i64, tpu.core_type = #tpu.core_type<tc>, window_params = [{transform_indices = @transform_0, window_bounds = array<i64: 16, 512>}, {transform_indices = @transform_1, window_bounds = array<i64: 16, 512>}, {transform_indices = @transform_2, window_bounds = array<i64: 1, 1, 1>}]} {
    %c0_i32 = arith.constant 0 : i32
    %0 = arith.cmpi eq, %arg1, %c0_i32 : i32
    %1 = arith.extui %0 : i1 to i32
    %c0_i32_0 = arith.constant 0 : i32
    %2 = arith.cmpi ne, %1, %c0_i32_0 : i32
    scf.if %2 {
      %cst_11 = arith.constant 0.000000e+00 : f32
      %25 = vector.broadcast %cst_11 : f32 to vector<8x512xf32>
      %c0_12 = arith.constant 0 : index
      %c0_13 = arith.constant 0 : index
      %26 = vector.load %arg5[%c0_12, %c0_13] : memref<8x512xf32, #tpu.memory_space<vmem>>, vector<8x512xf32>
      tpu.vector_store %arg5[%c0_12, %c0_13], %25 {strides = array<i32>} : memref<8x512xf32, #tpu.memory_space<vmem>>, vector<8x512xf32>,
    } else {
    }
    %c0 = arith.constant 0 : index
    %c0_1 = arith.constant 0 : index
    %3 = vector.load %arg2[%c0, %c0_1] : memref<16x512xf32, #tpu.memory_space<vmem>>, vector<16x512xf32>
    %c0_2 = arith.constant 0 : index
    %c0_3 = arith.constant 0 : index
    %4 = vector.load %arg3[%c0_2, %c0_3] : memref<16x512xf32, #tpu.memory_space<vmem>>, vector<16x512xf32>
    %5 = arith.subf %3, %4 : vector<16x512xf32>
    %6 = arith.mulf %5, %5 : vector<16x512xf32>
    %c1_i32 = arith.constant 1 : i32
    %7 = arith.muli %arg1, %c1_i32 : i32
    %8 = arith.addi %7, %arg0 : i32
    %c16_i32 = arith.constant 16 : i32
    %9 = arith.muli %8, %c16_i32 : i32
    %10 = tpu.iota {dimensions = array<i32: 0>} : vector<16x512xi32>
    %11 = vector.broadcast %9 : i32 to vector<16x512xi32>
    %12 = arith.addi %11, %10 : vector<16x512xi32>
    %c20_i32 = arith.constant 20 : i32
    %13 = vector.broadcast %c20_i32 : i32 to vector<16x512xi32>
    %14 = arith.cmpi slt, %12, %13 : vector<16x512xi32>
    %cst = arith.constant 0.000000e+00 : f32
    %15 = vector.broadcast %cst : f32 to vector<16x512xf32>
    %16 = arith.select %14, %6, %15 : vector<16x512xi1>, vector<16x512xf32>
    %c0_4 = arith.constant 0 : index
    %c0_5 = arith.constant 0 : index
    %17 = vector.load %arg5[%c0_4, %c0_5] : memref<8x512xf32, #tpu.memory_space<vmem>>, vector<8x512xf32>
    %18 = vector.shape_cast %16 : vector<16x512xf32> to vector<2x8x512xf32>
    %cst_6 = arith.constant dense<0.000000e+00> : vector<8x512xf32>
    %19 = vector.multi_reduction <add>, %18, %cst_6 [0] : vector<2x8x512xf32> to vector<8x512xf32>
    %20 = arith.addf %17, %19 : vector<8x512xf32>
    %c0_7 = arith.constant 0 : index
    %c0_8 = arith.constant 0 : index
    %21 = vector.load %arg5[%c0_7, %c0_8] : memref<8x512xf32, #tpu.memory_space<vmem>>, vector<8x512xf32>
    tpu.vector_store %arg5[%c0_7, %c0_8], %20 {strides = array<i32>} : memref<8x512xf32, #tpu.memory_space<vmem>>, vector<8x512xf32>,
    %c1_i32_9 = arith.constant 1 : i32
    %22 = arith.cmpi eq, %arg1, %c1_i32_9 : i32
    %23 = arith.extui %22 : i1 to i32
    %c0_i32_10 = arith.constant 0 : i32
    %24 = arith.cmpi ne, %23, %c0_i32_10 : i32
    scf.if %24 {
      %c0_11 = arith.constant 0 : index
      %c0_12 = arith.constant 0 : index
      %25 = vector.load %arg5[%c0_11, %c0_12] : memref<8x512xf32, #tpu.memory_space<vmem>>, vector<8x512xf32>
      %26 = vector.shape_cast %25 : vector<8x512xf32> to vector<1x8x512xf32>
      %cst_13 = arith.constant dense<0.000000e+00> : vector<1xf32>
      %27 = vector.multi_reduction <add>, %26, %cst_13 [1, 2] : vector<1x8x512xf32> to vector<1xf32>
      %28 = vector.shape_cast %27 : vector<1xf32> to vector<1x1x1xf32>
      %29 = vector.extract %28[0, 0, 0] : f32 from vector<1x1x1xf32>
      %30 = vector.broadcast %29 : f32 to vector<1x1x1xf32>
      %c0_14 = arith.constant 0 : index
      %c0_15 = arith.constant 0 : index
      %c0_16 = arith.constant 0 : index
      %31 = vector.load %arg4[%c0_14, %c0_15, %c0_16] : memref<1x1x1xf32, #tpu.memory_space<vmem>>, vector<1x1x1xf32>
      tpu.vector_store %arg4[%c0_14, %c0_15, %c0_16], %30 {strides = array<i32>} : memref<1x1x1xf32, #tpu.memory_space<vmem>>, vector<1x1x1xf32>,
    } else {
    }
    return
  }
  func.func @transform_0(%arg0: i32, %arg1: i32) -> (i32, i32) {
    %c1_i32 = arith.constant 1 : i32
    %0 = arith.muli %arg1, %c1_i32 : i32
    %1 = arith.addi %0, %arg0 : i32
    %c0_i32 = arith.constant 0 : i32
    %c0_i32_0 = arith.constant 0 : i32
    return %1, %c0_i32 : i32, i32
  }
  func.func @transform_1(%arg0: i32, %arg1: i32) -> (i32, i32) {
    %c1_i32 = arith.constant 1 : i32
    %0 = arith.muli %arg1, %c1_i32 : i32
    %1 = arith.addi %0, %arg0 : i32
    %c0_i32 = arith.constant 0 : i32
    %c0_i32_0 = arith.constant 0 : i32
    return %1, %c0_i32 : i32, i32
  }
  func.func @transform_2(%arg0: i32, %arg1: i32) -> (i32, i32, i32) {
    %c0_i32 = arith.constant 0 : i32
    %c0_i32_0 = arith.constant 0 : i32
    %c0_i32_1 = arith.constant 0 : i32
    return %arg0, %c0_i32, %c0_i32_0 : i32, i32, i32
  }
}

</mosaic_0001>

<bundles_post_ra>
// kernel: tpu_custom_call.1
= control target key start
LH: loop header
LB: loop body
LE: loop exit
PB: predicated region body
PF: predicated region fallthrough
CT: control target
= control target key end

     0   :  { %7 = vsyncpa [#allocation4], 0  ;;  %s930_s0 = inlined_call_operand.hbm [shape: f32[20,512], index: 0, kind: input, shape index: {}]   ;;  %s931_s1 = inlined_call_operand.hbm [shape: f32[20,512], index: 1, kind: input, shape index: {}]   ;;  %s932_s2 = inlined_call_operand.hbm [shape: f32[1,1,1], index: 2, kind: output, shape index: {}]  }
   0x1   :  { %9 = vsyncpa [#allocation4 + $0x1], 0 }
   0x2   :  { %10 = vsyncpa [#allocation7], 0 }
   0x3   :  { %12 = vsyncpa [#allocation7 + $0x1], 0 }
   0x4   :  { %13 = vsyncpa [#allocation5], 0  ;;  %s701_s9 = smov 0   ;;  %s703_s10 = smov 0  }
   0x5   :  { %s705_s11 = smov 0   ;;  %s707_s12 = smov 0  }
   0x6   :  { %s709_s13 = smov 0   ;;  %s711_s14 = smov 0  }
   0x7 LB: > { %s435_s15 = sadd.s32 4294967295, %s676_s14   ;;  %s28_s16 = sadd.s32 1, %s672_s13  ;;  %s676_s14 = sphi %s711_s14, %s19_s14   ;;  %s672_s13 = sphi %s709_s13, %s940_s13   ;;  %s668_s12 = sphi %s707_s12, %s939_s12   ;;  %s664_s11 = sphi %s705_s11, %s938_s11   ;;  %s660_s10 = sphi %s703_s10, %s937_s10   ;;  %s656_s9 = sphi %s701_s9, %s936_s9  }
   0x8   : > { %p29_p0 = scmp.ge.s32.totalorder %s28_s16, 2  ;;  %s40_s17 = sadd.s32 1, %s664_s11 }
   0x9   : > { %p47_p1 = scmp.ne.s32.totalorder %s664_s11, %s660_s10  ;;  %p48_p2 = scmp.eq.s32.totalorder %s676_s14, 0 }
   0xa   : > { %s942_s16 = smov (%p29_p0, %s28_s16), 0  ;;  %p53_p4 = scmp.ne.s32.totalorder %s660_s10, %s656_s9 }
   0xb   : > { %p737_p3 = por %p48_p2, %p47_p1  ;;  %s37_s19 = ssub.s32 %s672_s13, %s942_s16 }
   0xc   : > { %p54_p5 = scmp.eq.s32.totalorder %s435_s15, 0  ;;  %p38_p6 = scmp.eq.s32.totalorder %s37_s19, 0 }
   0xd   : > { %p437_p8 = scmp.ge.s32.totalorder %s676_s14, 2 }
   0xe   : > { %p746_p7 = por %p54_p5, %p53_p4 }
   0xf   : > { %s751_s21 = scalar_select %p38_p6, %s664_s11, %s40_s17  }
  0x10   : > { %127 = sbr.rel (%p437_p8) target bundleno = 93 (0x5d), region = 16 }
  0x17   : > { %130 = sbr.rel (!%p737_p3) target bundleno = 58 (0x3a), region = 20  ;;  %s131_s22 = sand.u32 (%p737_p3), 1, %s664_s11  }
  0x18   : > { %s439_s23 = sshll.u32 (%p737_p3), %s672_s13, 1  ;;  %s438_s24 = sshll.u32 (%p737_p3), %s131_s22, 6 }
  0x19   : > { %s138_s25 = ssub.s32 (%p737_p3), 3, %s439_s23  ;;  %s761_s28 = scalar_lea.sflag (%p737_p3), [#allocation4], %s131_s22 }
  0x1a   : > { %p139_p9 = scmp.lt.s32.totalorder (%p737_p3), %s138_s25, 2  ;;  %s135_s29 = scalar_lea.vmem (%p737_p3), [#allocation3], %s438_s24 }
  0x1e   : > { %s944_s25 = smov (!%p139_p9, %s138_s25), 2 }
  0x1f   : > { %s758_s26 = sshll.u32 %s944_s25, 9 }
  0x20   : > { %s144_s27 = ssub.s32 1024, %s758_s26 }
  0x21   : > { %145 = vsyncadd %s761_s28, %s144_s27  ;;  %p442_p10 = scmp.ne.s32.totalorder %s758_s26, 0  ;;  %s468_s30 = sshll.u32 %s672_s13, 10 }
  0x22   : > { %s769_s5 = scalar_lea.hbm %s930_s0, %s468_s30  ;;  %s151_s6 = sshll.u32 %s135_s29, 4  ;;  %s771_s6 = int_to_ptr.vmem [resolvable:$true] %s151_s6 }
  0x23   : > { %s536_s7 = scalar_lea.hbm %s769_s5, %s758_s26  ;;  %s540_s17 = scalar_lea.hbm %s930_s0, 1536 }
  0x24   : > { %p537_p11 = scmp.ne.s32.totalorder %s769_s5, %s536_s7  ;;  %p541_p0 = scmp.lt.u32.totalorder %s769_s5, %s930_s0 }
  0x25   : > { %p542_p1 = scmp.lt.u32.totalorder %s540_s17, %s536_s7  ;;  %p544_p4 = scmp.lt.u32.totalorder %s536_s7, %s769_s5 }
  0x26   : > { %p538_p12 = pnand %p537_p11, %p442_p10 }
  0x27   : > { %p543_p2 = por %p542_p1, %p541_p0 }
  0x28   : > { %p539_p13 = pneg %p538_p12 }
  0x29   : > { %p545_p5 = por %p544_p4, %p543_p2 }
  0x2b   : > { %p546_p6 = pnand %p545_p5, %p539_p13 }
  0x2d   : > { %549 = shalt.err (!%p546_p6)
}
  0x2e   : > { %s550_s23 = scalar_lea.vmem %s771_s6, %s758_s26  ;;  %s678_s24 = smov [#allocation3]  }
  0x2f   : > { %p551_p8 = scmp.ne.s32.totalorder %s771_s6, %s550_s23  ;;  %s554_s25 = sshll.u32 %s678_s24, 4  ;;  %s555_s25 = int_to_ptr.vmem [resolvable:$false] %s554_s25 }
  0x30   : > { %s556_s27 = scalar_lea.vmem %s555_s25, 2048  ;;  %p557_p12 = scmp.lt.s32.totalorder %s771_s6, %s555_s25 }
  0x31   : > { %p552_p9 = pnand %p551_p8, %p442_p10  ;;  %p558_p0 = scmp.lt.s32.totalorder %s556_s27, %s550_s23 }
  0x33   : > { %p553_p11 = pneg %p552_p9  ;;  %p559_p1 = por %p558_p0, %p557_p12 }
  0x35   : > { %p560_p2 = pnand %p559_p1, %p553_p11 }
  0x37   : > { %563 = shalt.err (!%p560_p2)
}
  0x38   : > { %s679_s29 = smov 512   ;;  %s680_s30 = smov 32  }
  0x39   : > { %157 = dma.hbm_to_vmem [thread:$0]  (%p442_p10), %s769_s5, %s758_s26, %s771_s6, %s761_s28, %s679_s29, %s679_s29, %s680_s30  }
  0x3a PF: > { %160 = sbr.rel (!%p737_p3) target bundleno = 93 (0x5d), region = 24  ;;  %s161_s3 = sand.u32 (%p737_p3), 1, %s664_s11  }
  0x3b   : > { %s448_s4 = sshll.u32 (%p737_p3), %s672_s13, 1  ;;  %s447_s7 = sshll.u32 (%p737_p3), %s161_s3, 6 }
  0x3c   : > { %s168_s8 = ssub.s32 (%p737_p3), 3, %s448_s4  ;;  %s805_s19 = scalar_lea.sflag (%p737_p3), [#allocation7], %s161_s3 }
  0x3d   : > { %p169_p13 = scmp.lt.s32.totalorder (%p737_p3), %s168_s8, 2  ;;  %s165_s26 = scalar_lea.vmem (%p737_p3), [#allocation6], %s447_s7 }
  0x41   : > { %s946_s8 = smov (!%p169_p13, %s168_s8), 2 }
  0x42   : > { %s802_s9 = sshll.u32 %s946_s8, 9 }
  0x43   : > { %s174_s17 = ssub.s32 1024, %s802_s9 }
  0x44   : > { %175 = vsyncadd %s805_s19, %s174_s17  ;;  %p451_p3 = scmp.ne.s32.totalorder %s802_s9, 0  ;;  %s471_s18 = sshll.u32 %s672_s13, 10 }
  0x45   : > { %s813_s6 = scalar_lea.hbm %s931_s1, %s471_s18  ;;  %s181_s22 = sshll.u32 %s165_s26, 4  ;;  %s815_s22 = int_to_ptr.vmem [resolvable:$true] %s181_s22 }
  0x46   : > { %s564_s23 = scalar_lea.hbm %s813_s6, %s802_s9  ;;  %s568_s27 = scalar_lea.hbm %s931_s1, 1536 }
  0x47   : > { %p565_p10 = scmp.ne.s32.totalorder %s813_s6, %s564_s23  ;;  %p569_p6 = scmp.lt.u32.totalorder %s813_s6, %s931_s1 }
  0x48   : > { %p570_p8 = scmp.lt.u32.totalorder %s568_s27, %s564_s23  ;;  %p572_p11 = scmp.lt.u32.totalorder %s564_s23, %s813_s6 }
  0x49   : > { %p566_p4 = pnand %p565_p10, %p451_p3 }
  0x4a   : > { %p571_p9 = por %p570_p8, %p569_p6 }
  0x4b   : > { %p567_p5 = pneg %p566_p4 }
  0x4c   : > { %p573_p12 = por %p572_p11, %p571_p9 }
  0x4e   : > { %p574_p0 = pnand %p573_p12, %p567_p5 }
  0x50   : > { %577 = shalt.err (!%p574_p0)
}
  0x51   : > { %s578_s3 = scalar_lea.vmem %s815_s22, %s802_s9  ;;  %s681_s4 = smov [#allocation6]  }
  0x52   : > { %p579_p1 = scmp.ne.s32.totalorder %s815_s22, %s578_s3  ;;  %s582_s7 = sshll.u32 %s681_s4, 4  ;;  %s583_s7 = int_to_ptr.vmem [resolvable:$false] %s582_s7 }
  0x53   : > { %s584_s8 = scalar_lea.vmem %s583_s7, 2048  ;;  %p585_p10 = scmp.lt.s32.totalorder %s815_s22, %s583_s7 }
  0x54   : > { %p580_p2 = pnand %p579_p1, %p451_p3  ;;  %p586_p4 = scmp.lt.s32.totalorder %s584_s8, %s578_s3 }
  0x56   : > { %p581_p13 = pneg %p580_p2  ;;  %p587_p6 = por %p586_p4, %p585_p10 }
  0x58   : > { %p588_p8 = pnand %p587_p6, %p581_p13 }
  0x5a   : > { %591 = shalt.err (!%p588_p8)
}
  0x5b   : > { %s682_s17 = smov 512   ;;  %s683_s26 = smov 32  }
  0x5c   : > { %187 = dma.hbm_to_vmem [thread:$0]  (%p451_p3), %s813_s6, %s802_s9, %s815_s22, %s805_s19, %s682_s17, %s682_s17, %s683_s26  }
  0x5d PF: > { %p456_p5 = scmp.ge.s32.totalorder %s676_s14, 1  ;;  %p189_p9 = scmp.lt.s32.totalorder %s676_s14, 3 }
  0x5f   : > { %p190_p11 = pnand %p456_p5, %p189_p9 }
  0x60   : > { %s195_s18 = sand.u32 (!%p190_p11), 1, %s660_s10  }
  0x61   : > { %193 = sbr.rel (%p190_p11) target bundleno = 375 (0x177), region = 28  ;;  %s457_s28 = sshll.u32 (!%p190_p11), %s195_s18, 6 }
  0x62   : > { %s196_s5 = scalar_lea.sflag (!%p190_p11), [#allocation4], %s195_s18  ;;  %s845_s23 = scalar_lea.vmem (!%p190_p11), [#allocation3], %s457_s28 }
  0x68   : > { %643 = dma.done.wait (%p746_p7), %s196_s5, 1024  }
  0x69   : > { %645 = vsyncadd (%p746_p7), %s196_s5, 4294966272  ;;  %s205_s9 = scalar_lea.sflag [#allocation7], %s195_s18  ;;  %s851_s19 = scalar_lea.vmem [#allocation6], %s457_s28 }
  0x6a   : > { %647 = dma.done.wait (%p746_p7), %s205_s9, 1024  }
  0x6b   : > { %649 = vsyncadd (%p746_p7), %s205_s9, 4294966272  ;;  %p459_p3 = scmp.ne.s32.totalorder %s668_s12, 0 }
  0x6c   : > { %v684_v0 = vmov (!%p459_p3), 0.0  }
  0x6d   : > { %246 = sbr.rel (%p459_p3) target bundleno = 116 (0x74), region = 40  ;;  %247 = vst [vmem:[#allocation2] sm:$0xff] (!%p459_p3), %v684_v0  ;;  %248 = vst [vmem:[#allocation2 + $0x8] sm:$0xff] (!%p459_p3), %v684_v0 }
  0x6e   : > { %249 = vst [vmem:[#allocation2 + $0x10] sm:$0xff] (!%p459_p3), %v684_v0  ;;  %250 = vst [vmem:[#allocation2 + $0x18] sm:$0xff] (!%p459_p3), %v684_v0 }
  0x74 PF: > { %v251_v1 = vld [vmem:[%s845_s23] sm:$0xff]  ;;  %s460_s20 = sshll.u32 %s668_s12, 4  ;;  %v285_v4 = vlaneseq  ;;  %v252_v8 = vld [vmem:[%s845_s23 + $0x8] sm:$0xff]  ;;  %v253_v17 = vld [vmem:[%s845_s23 + $0x10] sm:$0xff]  ;;  %p461_p7 = scmp.ne.s32.totalorder %s668_s12, 1 }
  0x75   : > { %v255_v2 = vld [vmem:[%s845_s23 + $0x20] sm:$0xff]  ;;  %v288_v7 = vstv %s460_s20  ;;  %v256_v11 = vld [vmem:[%s845_s23 + $0x28] sm:$0xff]  ;;  %v257_v18 = vld [vmem:[%s845_s23 + $0x30] sm:$0xff]  ;;  %vm338_vm2 = vcmask (!%p461_p7), 0  }
  0x76   : > { %v259_v3 = vld [vmem:[%s851_s19] sm:$0xff]  ;;  %v286_v10 = vshrl.u32 %v285_v4, 7  ;;  %v260_v12 = vld [vmem:[%s851_s19 + $0x8] sm:$0xff]  ;;  %v261_v22 = vld [vmem:[%s851_s19 + $0x10] sm:$0xff] }
  0x77   : > { %v263_v5 = vld [vmem:[%s851_s19 + $0x20] sm:$0xff]  ;;  %v267_v6 = vsub.f32 %v251_v1, %v259_v3  ;;  %v264_v13 = vld [vmem:[%s851_s19 + $0x28] sm:$0xff]  ;;  %v268_v15 = vsub.f32 %v252_v8, %v260_v12  ;;  %v265_v23 = vld [vmem:[%s851_s19 + $0x30] sm:$0xff]  ;;  %v269_v26 = vsub.f32 %v253_v17, %v261_v22 }
  0x78   : > { %v271_v9 = vsub.f32 %v255_v2, %v263_v5  ;;  %v272_v16 = vsub.f32 %v256_v11, %v264_v13  ;;  %v287_v20 = vadd.s32 8, %v286_v10  ;;  %v289_v21 = vadd.s32 %v288_v7, %v286_v10  ;;  %v254_v28 = vld [vmem:[%s845_s23 + $0x18] sm:$0xff]  ;;  %v301_v38 = vld [vmem:[#allocation2] sm:$0xff]  ;;  %v302_v43 = vld [vmem:[#allocation2 + $0x8] sm:$0xff] }
  0x79   : > { %v275_v14 = vmul.f32 %v267_v6, %v267_v6  ;;  %v276_v24 = vmul.f32 %v268_v15, %v268_v15  ;;  %v273_v27 = vsub.f32 %v257_v18, %v265_v23  ;;  %v258_v29 = vld [vmem:[%s845_s23 + $0x38] sm:$0xff]  ;;  %v277_v36 = vmul.f32 %v269_v26, %v269_v26  ;;  %v303_v46 = vld [vmem:[#allocation2 + $0x10] sm:$0xff] }
  0x7a   : > { %v279_v19 = vmul.f32 %v271_v9, %v271_v9  ;;  %v280_v25 = vmul.f32 %v272_v16, %v272_v16  ;;  %v262_v30 = vld [vmem:[%s851_s19 + $0x18] sm:$0xff]  ;;  %v290_v31 = vadd.s32 %v288_v7, %v287_v20  ;;  %vm291_vm0 = vcmp.lt.s32.totalorder %v289_v21, 20 }
  0x7b   : > { %v266_v32 = vld [vmem:[%s851_s19 + $0x38] sm:$0xff]  ;;  %v270_v33 = vsub.f32 %v254_v28, %v262_v30  ;;  %v293_v34 = vsel %vm291_vm0, %v275_v14, 0.0  ;;  %v294_v35 = vsel %vm291_vm0, %v276_v24, 0.0  ;;  %v281_v37 = vmul.f32 %v273_v27, %v273_v27 }
  0x7c   : > { %vm292_vm1 = vcmp.lt.s32.totalorder %v290_v31, 20  ;;  %v274_v39 = vsub.f32 %v258_v29, %v266_v32  ;;  %v295_v44 = vsel %vm291_vm0, %v277_v36, 0.0  ;;  %v304_v56 = vld [vmem:[#allocation2 + $0x18] sm:$0xff] }
  0x7d   : > { %v278_v40 = vmul.f32 %v270_v33, %v270_v33  ;;  %v297_v41 = vsel %vm292_vm1, %v279_v19, 0.0  ;;  %v298_v42 = vsel %vm292_vm1, %v280_v25, 0.0  ;;  %v299_v45 = vsel %vm292_vm1, %v281_v37, 0.0 }
  0x7e   : > { %v305_v47 = vadd.f32 %v297_v41, %v293_v34  ;;  %v306_v48 = vadd.f32 %v298_v42, %v294_v35  ;;  %v307_v49 = vadd.f32 %v299_v45, %v295_v44  ;;  %v282_v50 = vmul.f32 %v274_v39, %v274_v39 }
  0x7f   : > { %v296_v51 = vsel %vm291_vm0, %v278_v40, 0.0  ;;  %320 = sbr.rel (%p461_p7) target bundleno = 350 (0x15e), region = 44 }
  0x80   : > { %v309_v52 = vadd.f32 %v305_v47, %v301_v38  ;;  %v310_v53 = vadd.f32 %v306_v48, %v302_v43  ;;  %v311_v54 = vadd.f32 %v307_v49, %v303_v46  ;;  %v300_v55 = vsel %vm292_vm1, %v282_v50, 0.0 }
  0x81   : > { %v308_v57 = vadd.f32 %v300_v55, %v296_v51 }
  0x82   : > { %313 = vst [vmem:[#allocation2] sm:$0xff] %v309_v52  ;;  %314 = vst [vmem:[#allocation2 + $0x8] sm:$0xff] %v310_v53 }
  0x83   : > { %315 = vst [vmem:[#allocation2 + $0x10] sm:$0xff] %v311_v54  ;;  %v312_v58 = vadd.f32 %v308_v57, %v304_v56 }
  0x85   : > { %316 = vst [vmem:[#allocation2 + $0x18] sm:$0xff] %v312_v58 }
  0x89   : > { %v321_v59 = vld [vmem:[#allocation2] sm:$0xff]  ;;  %v322_v60 = vld [vmem:[#allocation2 + $0x8] sm:$0xff] }
  0x8a   : > { %v323_v61 = vld [vmem:[#allocation2 + $0x10] sm:$0xff]  ;;  %v325_v62 = vadd.f32 %v322_v60, %v321_v59 }
  0x8c   : > { %v324_v63 = vld [vmem:[#allocation2 + $0x18] sm:$0xff]  ;;  %v326_v0 = vadd.f32 %v325_v62, %v323_v61 }
  0x8e   : > { %v327_v1 = vadd.f32 %v326_v0, %v324_v63 }
  0x90   : > { %328 = vadd.xlane.f32.xlu0 %v327_v1 }
 0x11d   : > { %v329_v2 = vpop.xlane.xlu0 %328 }
 0x11e   : > { %v330_v3 = vrot.slane %v329_v2, 4 }
 0x120   : > { %v331_v4 = vadd.f32 %v330_v3, %v329_v2 }
 0x122   : > { %v332_v5 = vrot.slane %v331_v4, 2 }
 0x124   : > { %v333_v6 = vadd.f32 %v332_v5, %v331_v4 }
 0x126   : > { %v334_v7 = vrot.slane %v333_v6, 1 }
 0x128   : > { %v335_v8 = vadd.f32 %v334_v7, %v333_v6 }
 0x12a   : > { %472 = vpush %v335_v8 }
 0x15b   : > { %s473_s6 = spop %472 }
 0x15c   : > { %v337_v9 = vstv %s473_s6 }
 0x15d   : > { %339 = vst.msk [vmem:[#allocation8] sm:$0x1] %vm338_vm2, %v337_v9 }
 0x15e PF: > { %p886_p12 = scmp.eq.s32.totalorder %s435_s15, 1  ;;  %s685_s22 = smov [#allocation8]  }
 0x15f   : > { %s349_s24 = sshll.u32 %s685_s22, 4  ;;  %s350_s24 = int_to_ptr.vmem [resolvable:$true] %s349_s24 }
 0x160   : > { %s592_s25 = scalar_lea.vmem %s350_s24, 16  ;;  %s598_s27 = scalar_lea.vmem %s350_s24, 32 }
 0x161   : > { %p593_p0 = scmp.ne.s32.totalorder %s350_s24, %s592_s25  ;;  %p599_p13 = scmp.lt.s32.totalorder %s350_s24, %s350_s24 }
 0x162   : > { %p600_p10 = scmp.lt.s32.totalorder %s598_s27, %s592_s25 }
 0x163   : > { %p594_p1 = pnand %p593_p0, %p886_p12 }
 0x164   : > { %p601_p4 = por %p600_p10, %p599_p13 }
 0x165   : > { %p595_p2 = pneg %p594_p1 }
 0x167   : > { %p602_p6 = pnand %p601_p4, %p595_p2 }
 0x169   : > { %605 = shalt.err (!%p602_p6)
}
 0x16a   : > { %s606_s30 = scalar_lea.hbm %s932_s2, 16 }
 0x16b   : > { %p607_p8 = scmp.ne.s32.totalorder %s932_s2, %s606_s30  ;;  %p612_p11 = scmp.lt.u32.totalorder %s606_s30, %s932_s2 }
 0x16d   : > { %p608_p5 = pnand %p607_p8, %p886_p12 }
 0x16f   : > { %p609_p9 = pneg %p608_p5 }
 0x171   : > { %p614_p3 = pnand %p612_p11, %p609_p9 }
 0x173   : > { %617 = shalt.err (!%p614_p3)
}
 0x174   : > { %477 = dma.vmem_to_hbm [thread:$0]  (%p886_p12), %s350_s24, 16, %s932_s2, [#allocation5]  }
 0x175   : > { %651 = dma.done.wait (%p886_p12), [#allocation5], 16  }
 0x176   : > { %653 = vsyncadd (%p886_p12), [#allocation5], 4294967280 }
 0x177 PF: > { %s19_s14 = sadd.s32 1, %s676_s14   ;;  %s936_s9 = smov %s660_s10 }
 0x178   : > { %p16_p7 = scmp.ge.s32.totalorder %s19_s14, 4   ;;  %s937_s10 = smov %s664_s11 }
 0x179   : > { %s938_s11 = smov %s751_s21  ;;  %s939_s12 = smov %s672_s13 }
 0x17a   : > { %s940_s13 = smov %s942_s16  ;;  %18 = sbr.rel (!%p16_p7) target bundleno = 7 (0x7), region = 87 }
 0x181   :  { %362 = vsyncpa [#allocation4], 1 }
 0x182   :  { %364 = vsyncpa [#allocation4 + $0x1], 1 }
 0x183   :  { %365 = vsyncpa [#allocation7], 1 }
 0x184   :  { %367 = vsyncpa [#allocation7 + $0x1], 1 }
 0x185   :  { %368 = vsyncpa [#allocation5], 1 }
 0x186   :  { %370 = vsyncpa [#allocation5 + $0x1], 1 }

</bundles_post_ra>
